<compile_context>
chip_gen: v7x
topology: tpu7x:2x2x1
jax: 0.10.0
libtpu: 0.0.40
codegen_flags: <defaults>
</compile_context>

<pallas_src>
import functools
import math

import jax
import jax.numpy as jnp
from jax.experimental import pallas as pl
from jax.experimental.pallas import tpu as pltpu


def _round_up(v, m):
    return ((v + m - 1) // m) * m


def _vmem_capacity_bytes():
    """Physical VMEM per TensorCore, with a conservative (v7x-sized) fallback."""
    try:
        return int(pltpu.get_tpu_info().vmem_capacity_bytes)
    except Exception:
        return 64 * 1024 * 1024  # safe lower bound across v5e / v6e / v7x


def _num_tensorcores():
    """2 on megacore-style chips (v4 / v5p / v7x), else 1."""
    try:
        kind = jax.devices()[0].device_kind.lower()
    except Exception:
        return 1
    return 2 if any(t in kind for t in ("v7", "7x", "v4", "v5p")) else 1


def _spherical_block_kernel(x_ref, w1_ref, w2_ref, o_ref, *, matmul_dtype):
    # x_ref : (TM, CP) tile of the (possibly zero-padded) input.
    # w1_ref, w2_ref : (CP, CP) pre-scaled weights (1/sqrt(C) folded in),
    #                  grid-invariant (index_map is constant).
    x = x_ref[...].astype(jnp.float32)

    h = jax.nn.silu(x)                                   # pre_activation (0e scalars)
    h = jnp.dot(h.astype(matmul_dtype), w1_ref[...],     # pre_linear (norm folded in W1)
                preferred_element_type=jnp.float32)
    h = jax.nn.silu(h)                                   # post_activation
    h = jnp.dot(h.astype(matmul_dtype), w2_ref[...],     # post_linear (norm folded in W2)
                preferred_element_type=jnp.float32)

    o_ref[...] = (x + h).astype(o_ref.dtype)             # residual add in f32


def prepare_spherical_block_weights(w1, w2, *, matmul_dtype=jnp.bfloat16):
    """Fold 1/sqrt(C), zero-pad C -> multiple of 128 and cast — once per parameter set."""
    C = w1.shape[0]
    assert w1.shape == (C, C) and w2.shape == (C, C)
    CP = _round_up(C, 128)
    inv_sqrt_c = 1.0 / math.sqrt(C)  # fan_in is the true (unpadded) C

    def prep(w):
        w = w.astype(jnp.float32) * inv_sqrt_c
        if CP != C:
            w = jnp.zeros((CP, CP), jnp.float32).at[:C, :C].set(w)
        return w.astype(matmul_dtype)

    return prep(w1), prep(w2)


def _build_call(*, NP, CP, tm, io_dtype, matmul_dtype, single_buffer_weights,
                vmem_limit, cost):
    if single_buffer_weights:
        # Constant index_map => double-buffering the weights only wastes VMEM.
        w_spec = pl.BlockSpec((CP, CP), lambda i: (0, 0),
                              pipeline_mode=pl.Buffered(1))
    else:
        w_spec = pl.BlockSpec((CP, CP), lambda i: (0, 0))

    kernel = functools.partial(_spherical_block_kernel, matmul_dtype=matmul_dtype)
    return pl.pallas_call(
        kernel,
        out_shape=jax.ShapeDtypeStruct((NP, CP), io_dtype),
        grid_spec=pltpu.PrefetchScalarGridSpec(
            num_scalar_prefetch=0,
            grid=(NP // tm,),
            in_specs=[
                pl.BlockSpec((tm, CP), lambda i: (i, 0)),   # x tile (streamed)
                w_spec,                                      # W1 (grid-invariant)
                w_spec,                                      # W2 (grid-invariant)
            ],
            out_specs=pl.BlockSpec((tm, CP), lambda i: (i, 0)),
        ),
        compiler_params=pltpu.CompilerParams(
            dimension_semantics=("parallel",),
            vmem_limit_bytes=vmem_limit,
        ),
        cost_estimate=cost,
    )


def spherical_block(x, w1=None, w2=None, *, matmul_dtype=jnp.bfloat16,
                    prepared_weights=None, target_block_bytes=2 * 1024 * 1024):
    """x: [N, C]; w1/w2: [C, C] raw e3nn weights (or pass prepared_weights)."""
    N, C = x.shape
    CP = _round_up(C, 128)

    if prepared_weights is None:
        w1p, w2p = prepare_spherical_block_weights(w1, w2, matmul_dtype=matmul_dtype)
    else:
        w1p, w2p = prepared_weights
    assert w1p.shape == (CP, CP) and w2p.shape == (CP, CP)
    matmul_dtype = w1p.dtype

    io_dtype = x.dtype
    io_itemsize = jnp.dtype(io_dtype).itemsize
    w_itemsize = jnp.dtype(matmul_dtype).itemsize
    sub = 16 if io_itemsize == 2 else 8           # sublane packing of the row tile

    # --- Row tile: target ~target_block_bytes per x block, clamped so the
    # working set (double-buffered in/out tiles + weights + f32 intermediates)
    # fits under the chip's VMEM.
    cap = (_vmem_capacity_bytes() * 4) // 5        # ~80% of physical VMEM
    w_total = 2 * 2 * CP * CP * w_itemsize         # both weights, conservatively 2-buffered
    per_row = CP * (2 * 2 * io_itemsize + 4 * 4)   # in+out (x2 buffers) + ~4 f32 temps
    avail = cap - w_total - (4 << 20)              # headroom for internal scratch
    tm_max = max(sub, (avail // per_row) if avail > 0 else sub)
    # TODO(synk): add a K/column-tiled path for very large C on v7x, where the two
    # CPxCP weights alone exceed VMEM; current fallback only shrinks the row tile.

    tm = max(sub, min(4096, target_block_bytes // (CP * io_itemsize)))
    tm = min(tm, tm_max, _round_up(N, sub))
    n_tc = _num_tensorcores()
    if n_tc > 1:
        # Give each TensorCore at least one block (megacore shards the "parallel"
        # axis); on single-TC chips keep the biggest tile (fewer grid steps).
        tm = min(tm, max(sub, _round_up(pl.cdiv(N, n_tc), sub)))
    tm = max(sub, (tm // sub) * sub)
    NP = _round_up(N, tm)

    # --- Pad only when actually needed (otherwise skip two full-array HBM trips).
    padded = (NP != N) or (CP != C)
    xp = x if not padded else jnp.zeros((NP, CP), io_dtype).at[:N, :C].set(x)

    est = 2 * 2 * tm * CP * io_itemsize + w_total + 4 * tm * CP * 4
    vmem_limit = int(min(cap, max(16 * 1024 * 1024, est * 3 // 2)))

    cost = pl.CostEstimate(
        flops=2 * 2 * NP * CP * CP,                 # two CPxCP matmuls per row
        transcendentals=2 * NP * CP,                # two sigmoids per element
        bytes_accessed=2 * NP * CP * io_itemsize + 2 * CP * CP * w_itemsize,
    )

    # Single-buffer the grid-invariant weights when they are big enough to matter;
    # fall back to the default spec if pipeline_mode is rejected by this jax build.
    want_single = (2 * CP * CP * w_itemsize) >= (8 << 20)
    attempts = (True, False) if want_single else (False,)
    out, last_err = None, None
    for single in attempts:
        try:
            call = _build_call(NP=NP, CP=CP, tm=tm, io_dtype=io_dtype,
                               matmul_dtype=matmul_dtype,
                               single_buffer_weights=single,
                               vmem_limit=vmem_limit, cost=cost)
            out = call(xp, w1p, w2p)
            last_err = None
            break
        except Exception as e:  # pragma: no cover - pipeline_mode fallback
            last_err = e
    if last_err is not None:
        raise last_err

    return out[:N, :C] if padded else out


def spherical_block_ref(x, w1, w2):
    """Pure-JAX reference of the PyTorch/e3nn forward."""
    c = x.shape[-1]
    inv = 1.0 / math.sqrt(c)
    h = jax.nn.silu(x)
    h = (h @ w1) * inv
    h = jax.nn.silu(h)
    h = (h @ w2) * inv
    return x + h


if __name__ == "__main__":
    # Small shapes: N=128 "nodes", C=32 scalar channels (irreps "32x0e").
    N, C = 128, 32
    kx, k1, k2 = jax.random.split(jax.random.PRNGKey(0), 3)

    x = jax.random.normal(kx, (N, C), dtype=jnp.float32)
    # e3nn o3.Linear internal weights ~ N(0, 1); 1/sqrt(C) is folded in the wrapper.
    w1 = jax.random.normal(k1, (C, C), dtype=jnp.float32)
    w2 = jax.random.normal(k2, (C, C), dtype=jnp.float32)

    ref = spherical_block_ref(x, w1, w2)

    # Default path: bf16 MXU operands (f32 accumulation + f32 residual).
    out_bf16 = jax.block_until_ready(spherical_block(x, w1, w2))
    assert out_bf16.shape == (N, C) and out_bf16.dtype == x.dtype
    assert jnp.allclose(out_bf16, ref, atol=1e-1, rtol=1e-1), "bf16 path mismatch vs reference"

    # Exact-f32 path with weights prepared once and reused (parameter-prep pattern).
    prepared = prepare_spherical_block_weights(w1, w2, matmul_dtype=jnp.float32)
    out_f32 = jax.block_until_ready(spherical_block(x, prepared_weights=prepared))
    assert out_f32.shape == (N, C)
    assert jnp.allclose(out_f32, ref, atol=1e-5, rtol=1e-5), "f32 path mismatch vs reference"

    print("KERNEL_OK")
</pallas_src>

<mosaic_0001>
module attributes {stable_mosaic.version = 11 : i64} {
  func.func @_spherical_block_kernel(%arg0: i32, %arg1: memref<128x128xf32, #tpu.memory_space<vmem>>, %arg2: memref<128x128xbf16, #tpu.memory_space<vmem>>, %arg3: memref<128x128xbf16, #tpu.memory_space<vmem>>, %arg4: memref<128x128xf32, #tpu.memory_space<vmem>>) attributes {dimension_semantics = [#tpu.dimension_semantics<parallel>], iteration_bounds = array<i64: 1>, scalar_prefetch = 0 : i64, scratch_operands = 0 : i64, tpu.core_type = #tpu.core_type<tc>, window_params = [{transform_indices = @transform_0, window_bounds = array<i64: 128, 128>}, {pipeline_mode = #tpu.pipeline_mode<synchronous>, transform_indices = @transform_1, window_bounds = array<i64: 128, 128>}, {pipeline_mode = #tpu.pipeline_mode<synchronous>, transform_indices = @transform_2, window_bounds = array<i64: 128, 128>}, {transform_indices = @transform_3, window_bounds = array<i64: 128, 128>}]} {
    %c0 = arith.constant 0 : index
    %c0_0 = arith.constant 0 : index
    %0 = vector.load %arg1[%c0, %c0_0] : memref<128x128xf32, #tpu.memory_space<vmem>>, vector<128x128xf32>
    %1 = arith.negf %0 : vector<128x128xf32>
    %2 = math.exp %1 : vector<128x128xf32>
    %cst = arith.constant 1.000000e+00 : f32
    %3 = vector.broadcast %cst : f32 to vector<128x128xf32>
    %4 = arith.addf %3, %2 : vector<128x128xf32>
    %5 = arith.divf %3, %4 : vector<128x128xf32>
    %6 = arith.mulf %0, %5 : vector<128x128xf32>
    %7 = arith.truncf %6 : vector<128x128xf32> to vector<128x128xbf16>
    %c0_1 = arith.constant 0 : index
    %c0_2 = arith.constant 0 : index
    %8 = vector.load %arg2[%c0_1, %c0_2] : memref<128x128xbf16, #tpu.memory_space<vmem>>, vector<128x128xbf16>
    %cst_3 = arith.constant dense<0.000000e+00> : vector<128x128xf32>
    %9 = tpu.matmul %7, %8, %cst_3 {dimension_numbers = #tpu.dot_dimension_numbers<[1], [0], [0], [1], [0, 0, 1, 1], [], []>} : vector<128x128xbf16>, vector<128x128xbf16>, vector<128x128xf32> -> vector<128x128xf32>
    %10 = arith.negf %9 : vector<128x128xf32>
    %11 = math.exp %10 : vector<128x128xf32>
    %cst_4 = arith.constant 1.000000e+00 : f32
    %12 = vector.broadcast %cst_4 : f32 to vector<128x128xf32>
    %13 = arith.addf %12, %11 : vector<128x128xf32>
    %14 = arith.divf %12, %13 : vector<128x128xf32>
    %15 = arith.mulf %9, %14 : vector<128x128xf32>
    %16 = arith.truncf %15 : vector<128x128xf32> to vector<128x128xbf16>
    %c0_5 = arith.constant 0 : index
    %c0_6 = arith.constant 0 : index
    %17 = vector.load %arg3[%c0_5, %c0_6] : memref<128x128xbf16, #tpu.memory_space<vmem>>, vector<128x128xbf16>
    %cst_7 = arith.constant dense<0.000000e+00> : vector<128x128xf32>
    %18 = tpu.matmul %16, %17, %cst_7 {dimension_numbers = #tpu.dot_dimension_numbers<[1], [0], [0], [1], [0, 0, 1, 1], [], []>} : vector<128x128xbf16>, vector<128x128xbf16>, vector<128x128xf32> -> vector<128x128xf32>
    %19 = arith.addf %0, %18 : vector<128x128xf32>
    %c0_8 = arith.constant 0 : index
    %c0_9 = arith.constant 0 : index
    %20 = vector.load %arg4[%c0_8, %c0_9] : memref<128x128xf32, #tpu.memory_space<vmem>>, vector<128x128xf32>
    tpu.vector_store %arg4[%c0_8, %c0_9], %19 {strides = array<i32>} : memref<128x128xf32, #tpu.memory_space<vmem>>, vector<128x128xf32>,
    return
  }
  func.func @transform_0(%arg0: i32) -> (i32, i32) {
    %c0_i32 = arith.constant 0 : i32
    %c0_i32_0 = arith.constant 0 : i32
    return %arg0, %c0_i32 : i32, i32
  }
  func.func @transform_1(%arg0: i32) -> (i32, i32) {
    %c0_i32 = arith.constant 0 : i32
    %c0_i32_0 = arith.constant 0 : i32
    %c0_i32_1 = arith.constant 0 : i32
    return %c0_i32, %c0_i32_0 : i32, i32
  }
  func.func @transform_2(%arg0: i32) -> (i32, i32) {
    %c0_i32 = arith.constant 0 : i32
    %c0_i32_0 = arith.constant 0 : i32
    %c0_i32_1 = arith.constant 0 : i32
    return %c0_i32, %c0_i32_0 : i32, i32
  }
  func.func @transform_3(%arg0: i32) -> (i32, i32) {
    %c0_i32 = arith.constant 0 : i32
    %c0_i32_0 = arith.constant 0 : i32
    return %arg0, %c0_i32 : i32, i32
  }
}

</mosaic_0001>

<bundles_post_ra>
// kernel: tpu_custom_call.1
= control target key start
LH: loop header
LB: loop body
LE: loop exit
PB: predicated region body
PF: predicated region fallthrough
CT: control target
= control target key end

     0   :  { %8 = vsyncpa [#allocation3], 0  ;;  %s1307_s0 = inlined_call_operand.hbm [shape: f32[128,128], index: 0, kind: input, shape index: {}]   ;;  %s1308_s1 = inlined_call_operand.hbm [shape: bf16[128,128], index: 1, kind: input, shape index: {}]   ;;  %s1309_s2 = inlined_call_operand.hbm [shape: bf16[128,128], index: 2, kind: input, shape index: {}]   ;;  %s1310_s3 = inlined_call_operand.hbm [shape: f32[128,128], index: 3, kind: output, shape index: {}]  }
   0x1   :  { %9 = vsyncpa [#allocation6], 0 }
   0x2   :  { %10 = vsyncpa [#allocation4], 0  ;;  %s1075_s12 = smov [#allocation5]   ;;  %s981_s16 = scalar_lea.hbm %s1308_s1, 1024 }
   0x3   :  { %s28_s13 = sshll.u32 %s1075_s12, 4  ;;  %p982_p0 = scmp.ne.s32.totalorder %s1308_s1, %s981_s16  ;;  %s29_s13 = int_to_ptr.vmem [resolvable:$true] %s28_s13 }
   0x4   :  { %p985_p1 = scmp.lt.u32.totalorder %s981_s16, %s1308_s1 }
   0x6   :  { %p987_p2 = pnand %p985_p1, %p982_p0 }
   0x8   :  { %990 = shalt.err (!%p987_p2)
}
   0x9   :  { %s991_s21 = scalar_lea.vmem %s29_s13, 1024  ;;  %p996_p4 = scmp.lt.s32.totalorder %s29_s13, %s29_s13 }
   0xa   :  { %p992_p3 = scmp.ne.s32.totalorder %s29_s13, %s991_s21  ;;  %p997_p5 = scmp.lt.s32.totalorder %s991_s21, %s991_s21 }
   0xc   :  { %p998_p6 = por %p997_p5, %p996_p4 }
   0xe   :  { %p999_p7 = pnand %p998_p6, %p992_p3 }
  0x10   :  { %1002 = shalt.err (!%p999_p7)
}
  0x11   :  { %s1076_s22 = smov 64   ;;  %s1077_s23 = smov 4  }
  0x12   :  { %34 = dma.hbm_to_vmem [thread:$0]  %s1308_s1, 1024, %s29_s13, [#allocation6], %s1076_s22, %s1076_s22, %s1077_s23  }
  0x13   :  { %s1078_s26 = smov [#allocation2]   ;;  %s1003_s30 = scalar_lea.hbm %s1307_s0, 2048 }
  0x14   :  { %s16_s27 = sshll.u32 %s1078_s26, 4  ;;  %p1004_p8 = scmp.ne.s32.totalorder %s1307_s0, %s1003_s30  ;;  %s17_s27 = int_to_ptr.vmem [resolvable:$true] %s16_s27 }
  0x15   :  { %p1007_p9 = scmp.lt.u32.totalorder %s1003_s30, %s1307_s0 }
  0x17   :  { %p1009_p10 = pnand %p1007_p9, %p1004_p8 }
  0x19   :  { %1012 = shalt.err (!%p1009_p10)
}
  0x1a   :  { %s1013_s8 = scalar_lea.vmem %s17_s27, 2048  ;;  %p1018_p12 = scmp.lt.s32.totalorder %s17_s27, %s17_s27 }
  0x1b   :  { %p1014_p11 = scmp.ne.s32.totalorder %s17_s27, %s1013_s8  ;;  %p1019_p13 = scmp.lt.s32.totalorder %s1013_s8, %s1013_s8 }
  0x1d   :  { %p1020_p0 = por %p1019_p13, %p1018_p12 }
  0x1f   :  { %p1021_p1 = pnand %p1020_p0, %p1014_p11 }
  0x21   :  { %1024 = shalt.err (!%p1021_p1)
}
  0x22   :  { %s1079_s1 = smov 128   ;;  %s1080_s9 = smov 8  }
  0x23   :  { %22 = dma.hbm_to_vmem [thread:$0]  %s1307_s0, 2048, %s17_s27, [#allocation3], %s1079_s1, %s1079_s1, %s1080_s9  }
  0x24   :  { %s1081_s12 = smov [#allocation7]   ;;  %s1025_s16 = scalar_lea.hbm %s1309_s2, 1024 }
  0x25   :  { %s40_s13 = sshll.u32 %s1081_s12, 4  ;;  %p1026_p2 = scmp.ne.s32.totalorder %s1309_s2, %s1025_s16  ;;  %s41_s13 = int_to_ptr.vmem [resolvable:$true] %s40_s13 }
  0x26   :  { %p1029_p3 = scmp.lt.u32.totalorder %s1025_s16, %s1309_s2 }
  0x28   :  { %p1031_p4 = pnand %p1029_p3, %p1026_p2 }
  0x2a   :  { %1034 = shalt.err (!%p1031_p4)
}
  0x2b   :  { %s1035_s21 = scalar_lea.vmem %s41_s13, 1024  ;;  %p1040_p6 = scmp.lt.s32.totalorder %s41_s13, %s41_s13 }
  0x2c   :  { %p1036_p5 = scmp.ne.s32.totalorder %s41_s13, %s1035_s21  ;;  %p1041_p7 = scmp.lt.s32.totalorder %s1035_s21, %s1035_s21 }
  0x2e   :  { %p1042_p8 = por %p1041_p7, %p1040_p6 }
  0x30   :  { %p1043_p9 = pnand %p1042_p8, %p1036_p5 }
  0x32   :  { %1046 = shalt.err (!%p1043_p9)
}
  0x33   :  { %46 = dma.hbm_to_vmem [thread:$0]  %s1309_s2, 1024, %s41_s13, [#allocation6], %s1076_s22, %s1076_s22, %s1077_s23  }
  0x34   :  { %1069 = dma.done.wait [#allocation3], 2048  }
  0x35   :  { %1070 = vsyncadd [#allocation3], 4294965248 }
  0x36   :  { %1071 = dma.done.wait [#allocation6], 2048  }
  0x37   :  { %1072 = vsyncadd [#allocation6], 4294965248  ;;  %v837_v0 = vld [vmem:[#allocation5] sm:$0xff]   ;;  %v838_v1 = vld [vmem:[#allocation5 + $0x8] sm:$0xff]   ;;  %s1082_s2 = smov [#allocation8]  }
  0x38   :  { %765 = vmatprep.subr.bf16.mxu0 %v837_v0  ;;  %v839_v2 = vld [vmem:[#allocation5 + $0x10] sm:$0xff]   ;;  %v840_v3 = vld [vmem:[#allocation5 + $0x18] sm:$0xff]   ;;  %v1148_v4 = vld [vmem:[#allocation2] sm:$0xff]  ;;  %s672_s22 = sshll.u32 %s1082_s2, 4  ;;  %s673_s22 = int_to_ptr.vmem [resolvable:$true] %s672_s22 }
  0x39   :  { %766 = vmatpush3.bf16.msra.mxu0 %v837_v0  ;;  %v1150_v5 = vld [vmem:[#allocation2 + $0x8] sm:$0xff]  ;;  %v1152_v6 = vld [vmem:[#allocation2 + $0x10] sm:$0xff]  ;;  %v685_v7 = vmul.f32 -1.442695, %v1148_v4  ;;  %v1156_v9 = vld [vmem:[#allocation2 + $0x18] sm:$0xff]  ;;  %s1047_s23 = scalar_lea.vmem %s673_s22, 2048  ;;  %p1052_p11 = scmp.lt.s32.totalorder %s673_s22, %s673_s22 }
  0x3a   :  { %767 = vmatprep.subr.bf16.mxu0 %v838_v1  ;;  %v686_v8 = vmul.f32 -1.442695, %v1150_v5  ;;  %v1158_v10 = vld [vmem:[#allocation2 + $0x20] sm:$0xff]  ;;  %v687_v11 = vmul.f32 -1.442695, %v1152_v6  ;;  %v1162_v13 = vld [vmem:[#allocation2 + $0x28] sm:$0xff]  ;;  %p1048_p10 = scmp.ne.s32.totalorder %s673_s22, %s1047_s23  ;;  %p1053_p12 = scmp.lt.s32.totalorder %s1047_s23, %s1047_s23 }
  0x3b   :  { %v688_v12 = vmul.f32 -1.442695, %v1156_v9  ;;  %v1164_v14 = vld [vmem:[#allocation2 + $0x30] sm:$0xff]  ;;  %v841_v15 = vld [vmem:[#allocation5 + $0x20] sm:$0xff]   ;;  %853 = vpow2.f32 %v685_v7  ;;  %v689_v16 = vmul.f32 -1.442695, %v1158_v10 }
  0x3c   :  { %v1167_v17 = vld [vmem:[#allocation2 + $0x38] sm:$0xff]  ;;  %855 = vpow2.f32 %v686_v8  ;;  %v690_v18 = vmul.f32 -1.442695, %v1162_v13  ;;  %v1170_v19 = vld [vmem:[#allocation2 + $0x40] sm:$0xff]  ;;  %v1172_v20 = vld [vmem:[#allocation2 + $0x48] sm:$0xff]  ;;  %p1054_p13 = por %p1053_p12, %p1052_p11 }
  0x3d   :  { %768 = vmatpush3.bf16.msra.mxu0 %v838_v1  ;;  %v1174_v21 = vld [vmem:[#allocation2 + $0x50] sm:$0xff]  ;;  %857 = vpow2.f32 %v687_v11  ;;  %v691_v22 = vmul.f32 -1.442695, %v1164_v14  ;;  %v1177_v23 = vld [vmem:[#allocation2 + $0x58] sm:$0xff]  ;;  %v1179_v24 = vld [vmem:[#allocation2 + $0x60] sm:$0xff] }
  0x3e   :  { %769 = vmatprep.subr.bf16.mxu0 %v839_v2  ;;  %v842_v25 = vld [vmem:[#allocation5 + $0x28] sm:$0xff]   ;;  %859 = vpow2.f32 %v688_v12  ;;  %v692_v26 = vmul.f32 -1.442695, %v1167_v17  ;;  %v693_v27 = vmul.f32 -1.442695, %v1170_v19  ;;  %v843_v32 = vld [vmem:[#allocation5 + $0x30] sm:$0xff]   ;;  %p1055_p0 = pnand %p1054_p13, %p1048_p10 }
  0x3f   :  { %861 = vpow2.f32 %v689_v16  ;;  %v694_v28 = vmul.f32 -1.442695, %v1172_v20  ;;  %v695_v29 = vmul.f32 -1.442695, %v1174_v21  ;;  %v696_v30 = vmul.f32 -1.442695, %v1177_v23 }
  0x40   :  { %863 = vpow2.f32 %v690_v18  ;;  %v697_v31 = vmul.f32 -1.442695, %v1179_v24  ;;  %v844_v39 = vld [vmem:[#allocation5 + $0x38] sm:$0xff]   ;;  %v1187_v51 = vld [vmem:[#allocation2 + $0x68] sm:$0xff]  ;;  %v1189_v56 = vld [vmem:[#allocation2 + $0x70] sm:$0xff] }
  0x41   :  { %770 = vmatpush3.bf16.msra.mxu0 %v839_v2  ;;  %865 = vpow2.f32 %v691_v22  ;;  %v698_v59 = vmul.f32 -1.442695, %v1187_v51  ;;  %v1192_v60 = vld [vmem:[#allocation2 + $0x78] sm:$0xff]  ;;  %v699_v0 = vmul.f32 -1.442695, %v1189_v56 }
  0x42   :  { %771 = vmatprep.subr.bf16.mxu0 %v840_v3  ;;  %867 = vpow2.f32 %v692_v26 }
  0x43   :  { %869 = vpow2.f32 %v693_v27 }
  0x44   :  { %871 = vpow2.f32 %v694_v28 }
  0x45   :  { %772 = vmatpush3.bf16.msra.mxu0 %v840_v3  ;;  %v854_v33 = vpop.eup %853  ;;  %873 = vpow2.f32 %v695_v29  ;;  %v700_v3 = vmul.f32 -1.442695, %v1192_v60 }
  0x46   :  { %773 = vmatprep.subr.bf16.mxu0 %v841_v15  ;;  %v856_v34 = vpop.eup %855  ;;  %v121_v35 = vadd.f32 1.0, %v854_v33  ;;  %875 = vpow2.f32 %v696_v30 }
  0x47   :  { %v858_v36 = vpop.eup %857  ;;  %v122_v37 = vadd.f32 1.0, %v856_v34  ;;  %877 = vpow2.f32 %v697_v31 }
  0x48   :  { %v860_v38 = vpop.eup %859  ;;  %879 = vrcp.f32 %v121_v35  ;;  %v123_v40 = vadd.f32 1.0, %v858_v36 }
  0x49   :  { %774 = vmatpush3.bf16.msra.mxu0 %v841_v15  ;;  %v862_v41 = vpop.eup %861  ;;  %881 = vrcp.f32 %v122_v37  ;;  %v124_v42 = vadd.f32 1.0, %v860_v38 }
  0x4a   :  { %775 = vmatprep.subr.bf16.mxu0 %v842_v25  ;;  %v864_v43 = vpop.eup %863  ;;  %883 = vrcp.f32 %v123_v40  ;;  %v125_v44 = vadd.f32 1.0, %v862_v41 }
  0x4b   :  { %v866_v45 = vpop.eup %865  ;;  %885 = vrcp.f32 %v124_v42  ;;  %v126_v46 = vadd.f32 1.0, %v864_v43 }
  0x4c   :  { %v868_v47 = vpop.eup %867  ;;  %887 = vrcp.f32 %v125_v44  ;;  %v127_v48 = vadd.f32 1.0, %v866_v45 }
  0x4d   :  { %776 = vmatpush3.bf16.msra.mxu0 %v842_v25  ;;  %v870_v49 = vpop.eup %869  ;;  %889 = vrcp.f32 %v126_v46  ;;  %v128_v50 = vadd.f32 1.0, %v868_v47 }
  0x4e   :  { %777 = vmatprep.subr.bf16.mxu0 %v843_v32  ;;  %v872_v52 = vpop.eup %871  ;;  %891 = vrcp.f32 %v127_v48  ;;  %v129_v53 = vadd.f32 1.0, %v870_v49 }
  0x4f   :  { %v874_v54 = vpop.eup %873  ;;  %893 = vrcp.f32 %v128_v50  ;;  %v130_v55 = vadd.f32 1.0, %v872_v52 }
  0x50   :  { %v876_v57 = vpop.eup %875  ;;  %895 = vrcp.f32 %v129_v53  ;;  %v131_v58 = vadd.f32 1.0, %v874_v54 }
  0x51   :  { %778 = vmatpush3.bf16.msra.mxu0 %v843_v32  ;;  %v878_v61 = vpop.eup %877  ;;  %897 = vrcp.f32 %v130_v55  ;;  %v132_v62 = vadd.f32 1.0, %v876_v57 }
  0x52   :  { %779 = vmatprep.subr.bf16.mxu0 %v844_v39  ;;  %v880_v63 = vpop.eup %879  ;;  %899 = vrcp.f32 %v131_v58  ;;  %v133_v30 = vadd.f32 1.0, %v878_v61 }
  0x53   :  { %v882_v1 = vpop.eup %881  ;;  %v169_v2 = vmul.f32 %v880_v63, %v1148_v4  ;;  %901 = vpow2.f32 %v698_v59 }
  0x54   :  { %v884_v7 = vpop.eup %883  ;;  %v170_v8 = vmul.f32 %v882_v1, %v1150_v5  ;;  %903 = vrcp.f32 %v132_v62  ;;  %v846_v1 = vld [vmem:[#allocation7 + $0x8] sm:$0xff]  }
  0x55   :  { %780 = vmatpush3.bf16.msra.mxu0 %v844_v39  ;;  %v886_v11 = vpop.eup %885  ;;  %v171_v12 = vmul.f32 %v884_v7, %v1152_v6  ;;  %905 = vpow2.f32 %v699_v0  ;;  %v845_v0 = vld [vmem:[#allocation7] sm:$0xff]  }
  0x56   :  { %v888_v15 = vpop.eup %887  ;;  %v185_v16 = vpack.c.bf16 %v170_v8, %v169_v2  ;;  %v172_v18 = vmul.f32 %v886_v11, %v1156_v9  ;;  %907 = vpow2.f32 %v700_v3  ;;  %797 = vmatprep.subr.bf16.mxu1 %v845_v0  ;;  %v847_v2 = vld [vmem:[#allocation7 + $0x10] sm:$0xff]   ;;  %v848_v3 = vld [vmem:[#allocation7 + $0x18] sm:$0xff]   ;;  %v849_v7 = vld [vmem:[#allocation7 + $0x20] sm:$0xff]  }
  0x57   :  { %v890_v22 = vpop.eup %889  ;;  %v173_v25 = vmul.f32 %v888_v15, %v1158_v10  ;;  %909 = vrcp.f32 %v133_v30  ;;  %798 = vmatpush3.bf16.msra.mxu1 %v845_v0  ;;  %v850_v8 = vld [vmem:[#allocation7 + $0x28] sm:$0xff]   ;;  %v851_v11 = vld [vmem:[#allocation7 + $0x30] sm:$0xff]  }
  0x58   :  { %v892_v26 = vpop.eup %891  ;;  %781 = vmatprep.mubr.bf16.mxu0 %v185_v16  ;;  %v186_v27 = vpack.c.bf16 %v172_v18, %v171_v12  ;;  %v174_v28 = vmul.f32 %v890_v22, %v1162_v13  ;;  %799 = vmatprep.subr.bf16.mxu1 %v846_v1  ;;  %v852_v12 = vld [vmem:[#allocation7 + $0x38] sm:$0xff]  }
  0x59   :  { %v894_v29 = vpop.eup %893  ;;  %v175_v33 = vmul.f32 %v892_v26, %v1164_v14 }
  0x5a   :  { %v896_v31 = vpop.eup %895  ;;  %782 = vmatmul.mubr.bf16.vlgmr.msra.gmra.mrb[0].mxu0 %v186_v27  ;;  %v187_v32 = vpack.c.bf16 %v174_v28, %v173_v25  ;;  %v176_v34 = vmul.f32 %v894_v29, %v1167_v17 }
  0x5b   :  { %v898_v35 = vpop.eup %897  ;;  %v177_v36 = vmul.f32 %v896_v31, %v1170_v19  ;;  %800 = vmatpush3.bf16.msra.mxu1 %v846_v1 }
  0x5c   :  { %785 = vmatprep.mubr.bf16.mxu0 %v187_v32  ;;  %v178_v37 = vmul.f32 %v898_v35, %v1172_v20  ;;  %v900_v38 = vpop.eup %899  ;;  %v188_v40 = vpack.c.bf16 %v176_v34, %v175_v33  ;;  %801 = vmatprep.subr.bf16.mxu1 %v847_v2 }
  0x5d   :  { %v902_v39 = vpop.eup %901  ;;  %v179_v47 = vmul.f32 %v900_v38, %v1174_v21 }
  0x5e   :  { %v904_v41 = vpop.eup %903  ;;  %v189_v42 = vpack.c.bf16 %v178_v37, %v177_v36  ;;  %v134_v43 = vadd.f32 1.0, %v902_v39 }
  0x5f   :  { %v906_v44 = vpop.eup %905  ;;  %v180_v48 = vmul.f32 %v904_v41, %v1177_v23  ;;  %802 = vmatpush3.bf16.msra.mxu1 %v847_v2 }
  0x60   :  { %v908_v45 = vpop.eup %907  ;;  %911 = vrcp.f32 %v134_v43  ;;  %v135_v46 = vadd.f32 1.0, %v906_v44  ;;  %803 = vmatprep.subr.bf16.mxu1 %v848_v3 }
  0x61   :  { %v136_v49 = vadd.f32 1.0, %v908_v45  ;;  %v190_v50 = vpack.c.bf16 %v180_v48, %v179_v47  ;;  %v910_v52 = vpop.eup %909 }
  0x62   :  { %786 = vmatmul.mubr.bf16.gmra.mrb[4].mxu0 %v188_v40  ;;  %913 = vrcp.f32 %v135_v46  ;;  %v181_v53 = vmul.f32 %v910_v52, %v1179_v24 }
  0x63   :  { %789 = vmatprep.mubr.bf16.mxu0 %v189_v42  ;;  %915 = vrcp.f32 %v136_v49  ;;  %804 = vmatpush3.bf16.msra.mxu1 %v848_v3 }
  0x64   :  { %805 = vmatprep.subr.bf16.mxu1 %v849_v7 }
  0x67   :  { %806 = vmatpush3.bf16.msra.mxu1 %v849_v7 }
  0x68   :  { %807 = vmatprep.subr.bf16.mxu1 %v850_v8 }
  0x6a   :  { %790 = vmatmul.mubr.bf16.gmra.mrb[8].mxu0 %v190_v50  ;;  %v912_v54 = vpop.eup %911 }
  0x6b   :  { %v182_v55 = vmul.f32 %v912_v54, %v1187_v51  ;;  %808 = vmatpush3.bf16.msra.mxu1 %v850_v8 }
  0x6c   :  { %v914_v57 = vpop.eup %913  ;;  %809 = vmatprep.subr.bf16.mxu1 %v851_v11 }
  0x6d   :  { %v916_v58 = vpop.eup %915  ;;  %v191_v59 = vpack.c.bf16 %v182_v55, %v181_v53  ;;  %v183_v61 = vmul.f32 %v914_v57, %v1189_v56 }
  0x6e   :  { %v184_v62 = vmul.f32 %v916_v58, %v1192_v60 }
  0x6f   :  { %793 = vmatprep.mubr.bf16.mxu0 %v191_v59  ;;  %810 = vmatpush3.bf16.msra.mxu1 %v851_v11 }
  0x70   :  { %v192_v63 = vpack.c.bf16 %v184_v62, %v183_v61  ;;  %811 = vmatprep.subr.bf16.mxu1 %v852_v12 }
  0x72   :  { %794 = vmatmul.mubr.bf16.gmra.mrb[12].mxu0 %v192_v63 }
  0x73   :  { %812 = vmatpush3.bf16.msra.mxu1 %v852_v12 }
 0x12d   :  { %v1212_v15 = vpop.f32.mrb[0].mxu0 }
 0x12e   :  { %v711_v16 = vmul.f32 -1.442695, %v1212_v15  ;;  %v1215_v18 = vpop.f32.mrb[1].mxu0 }
 0x12f   :  { %v709_v22 = vmul.f32 -1.442695, %v1215_v18  ;;  %v1218_v25 = vpop.f32.mrb[2].mxu0 }
 0x130   :  { %917 = vpow2.f32 %v711_v16  ;;  %v712_v26 = vmul.f32 -1.442695, %v1218_v25  ;;  %v1221_v27 = vpop.f32.mrb[3].mxu0 }
 0x131   :  { %919 = vpow2.f32 %v709_v22  ;;  %v710_v28 = vmul.f32 -1.442695, %v1221_v27 }
 0x132   :  { %921 = vpow2.f32 %v712_v26 }
 0x133   :  { %923 = vpow2.f32 %v710_v28 }
 0x135   :  { %v1224_v29 = vpop.f32.mrb[4].mxu0 }
 0x136   :  { %v715_v30 = vmul.f32 -1.442695, %v1224_v29  ;;  %v1227_v31 = vpop.f32.mrb[5].mxu0 }
 0x137   :  { %v713_v32 = vmul.f32 -1.442695, %v1227_v31  ;;  %v1230_v33 = vpop.f32.mrb[6].mxu0 }
 0x138   :  { %925 = vpow2.f32 %v715_v30  ;;  %v716_v34 = vmul.f32 -1.442695, %v1230_v33  ;;  %v1233_v35 = vpop.f32.mrb[7].mxu0 }
 0x139   :  { %927 = vpow2.f32 %v713_v32  ;;  %v714_v36 = vmul.f32 -1.442695, %v1233_v35 }
 0x13a   :  { %v918_v37 = vpop.eup %917  ;;  %929 = vpow2.f32 %v716_v34 }
 0x13b   :  { %v920_v38 = vpop.eup %919  ;;  %v404_v39 = vadd.f32 1.0, %v918_v37  ;;  %931 = vpow2.f32 %v714_v36 }
 0x13c   :  { %v922_v40 = vpop.eup %921  ;;  %v402_v41 = vadd.f32 1.0, %v920_v38 }
 0x13d   :  { %v924_v42 = vpop.eup %923  ;;  %933 = vrcp.f32 %v404_v39  ;;  %v405_v43 = vadd.f32 1.0, %v922_v40  ;;  %v1236_v44 = vpop.f32.mrb[8].mxu0 }
 0x13e   :  { %935 = vrcp.f32 %v402_v41  ;;  %v403_v45 = vadd.f32 1.0, %v924_v42  ;;  %v719_v46 = vmul.f32 -1.442695, %v1236_v44  ;;  %v1239_v47 = vpop.f32.mrb[9].mxu0 }
 0x13f   :  { %937 = vrcp.f32 %v405_v43  ;;  %v717_v48 = vmul.f32 -1.442695, %v1239_v47  ;;  %v1242_v49 = vpop.f32.mrb[10].mxu0 }
 0x140   :  { %939 = vrcp.f32 %v403_v45  ;;  %v720_v50 = vmul.f32 -1.442695, %v1242_v49  ;;  %v1245_v52 = vpop.f32.mrb[11].mxu0 }
 0x141   :  { %941 = vpow2.f32 %v719_v46  ;;  %v718_v53 = vmul.f32 -1.442695, %v1245_v52 }
 0x142   :  { %v926_v54 = vpop.eup %925  ;;  %943 = vpow2.f32 %v717_v48 }
 0x143   :  { %v928_v55 = vpop.eup %927  ;;  %v408_v57 = vadd.f32 1.0, %v926_v54  ;;  %945 = vpow2.f32 %v720_v50 }
 0x144   :  { %v930_v58 = vpop.eup %929  ;;  %v406_v59 = vadd.f32 1.0, %v928_v55  ;;  %947 = vpow2.f32 %v718_v53 }
 0x145   :  { %v932_v61 = vpop.eup %931  ;;  %949 = vrcp.f32 %v408_v57  ;;  %v409_v62 = vadd.f32 1.0, %v930_v58  ;;  %v1248_v0 = vpop.f32.mrb[12].mxu0 }
 0x146   :  { %951 = vrcp.f32 %v406_v59  ;;  %v407_v63 = vadd.f32 1.0, %v932_v61  ;;  %v723_v2 = vmul.f32 -1.442695, %v1248_v0  ;;  %v1251_v3 = vpop.f32.mrb[13].mxu0 }
 0x147   :  { %v934_v1 = vpop.eup %933  ;;  %953 = vrcp.f32 %v409_v62  ;;  %v721_v8 = vmul.f32 -1.442695, %v1251_v3  ;;  %v1254_v11 = vpop.f32.mrb[14].mxu0 }
 0x148   :  { %v936_v7 = vpop.eup %935  ;;  %955 = vrcp.f32 %v407_v63  ;;  %v724_v16 = vmul.f32 -1.442695, %v1254_v11  ;;  %v1257_v22 = vpop.f32.mrb[15].mxu0  ;;  %v452_v28 = vmul.f32 %v934_v1, %v1212_v15 }
 0x149   :  { %v938_v12 = vpop.eup %937  ;;  %957 = vpow2.f32 %v723_v2  ;;  %v722_v32 = vmul.f32 -1.442695, %v1257_v22  ;;  %v450_v36 = vmul.f32 %v936_v7, %v1215_v18 }
 0x14a   :  { %v940_v26 = vpop.eup %939  ;;  %v453_v30 = vmul.f32 %v938_v12, %v1218_v25  ;;  %959 = vpow2.f32 %v721_v8 }
 0x14b   :  { %v942_v34 = vpop.eup %941  ;;  %v451_v37 = vmul.f32 %v940_v26, %v1221_v27  ;;  %961 = vpow2.f32 %v724_v16 }
 0x14c   :  { %v944_v38 = vpop.eup %943  ;;  %v467_v39 = vpack.c.bf16 %v453_v30, %v452_v28  ;;  %v412_v40 = vadd.f32 1.0, %v942_v34  ;;  %963 = vpow2.f32 %v722_v32 }
 0x14d   :  { %v946_v41 = vpop.eup %945  ;;  %v410_v42 = vadd.f32 1.0, %v944_v38  ;;  %v466_v43 = vpack.c.bf16 %v451_v37, %v450_v36 }
 0x14e   :  { %v948_v45 = vpop.eup %947  ;;  %965 = vrcp.f32 %v412_v40  ;;  %v413_v15 = vadd.f32 1.0, %v946_v41 }
 0x14f   :  { %v950_v25 = vpop.eup %949  ;;  %967 = vrcp.f32 %v410_v42  ;;  %v411_v46 = vadd.f32 1.0, %v948_v45  ;;  %813 = vmatprep.mubr.bf16.mxu1 %v466_v43 }
 0x150   :  { %v952_v48 = vpop.eup %951  ;;  %969 = vrcp.f32 %v413_v15  ;;  %814 = vmatmul.mubr.bf16.vlgmr.msra.gmra.mrb[0].mxu1 %v467_v39  ;;  %v456_v50 = vmul.f32 %v950_v25, %v1224_v29 }
 0x151   :  { %v954_v18 = vpop.eup %953  ;;  %971 = vrcp.f32 %v411_v46  ;;  %v454_v55 = vmul.f32 %v952_v48, %v1227_v31 }
 0x152   :  { %v956_v27 = vpop.eup %955  ;;  %v457_v53 = vmul.f32 %v954_v18, %v1230_v33 }
 0x153   :  { %v958_v54 = vpop.eup %957  ;;  %v455_v57 = vmul.f32 %v956_v27, %v1233_v35 }
 0x154   :  { %v960_v58 = vpop.eup %959  ;;  %v469_v59 = vpack.c.bf16 %v457_v53, %v456_v50  ;;  %v416_v61 = vadd.f32 1.0, %v958_v54 }
 0x155   :  { %v962_v62 = vpop.eup %961  ;;  %v468_v63 = vpack.c.bf16 %v455_v57, %v454_v55  ;;  %v414_v1 = vadd.f32 1.0, %v960_v58 }
 0x156   :  { %v964_v2 = vpop.eup %963  ;;  %973 = vrcp.f32 %v416_v61  ;;  %v417_v7 = vadd.f32 1.0, %v962_v62 }
 0x157   :  { %975 = vrcp.f32 %v414_v1  ;;  %v415_v8 = vadd.f32 1.0, %v964_v2  ;;  %817 = vmatprep.mubr.bf16.mxu1 %v468_v63 }
 0x158   :  { %v966_v29 = vpop.eup %965  ;;  %977 = vrcp.f32 %v417_v7  ;;  %818 = vmatmul.mubr.bf16.gmra.mrb[4].mxu1 %v469_v59 }
 0x159   :  { %v968_v33 = vpop.eup %967  ;;  %979 = vrcp.f32 %v415_v8  ;;  %v460_v35 = vmul.f32 %v966_v29, %v1236_v44 }
 0x15a   :  { %v970_v31 = vpop.eup %969  ;;  %v458_v26 = vmul.f32 %v968_v33, %v1239_v47 }
 0x15b   :  { %v972_v12 = vpop.eup %971  ;;  %v461_v16 = vmul.f32 %v970_v31, %v1242_v49 }
 0x15c   :  { %v459_v28 = vmul.f32 %v972_v12, %v1245_v52 }
 0x15d   :  { %v471_v30 = vpack.c.bf16 %v461_v16, %v460_v35 }
 0x15e   :  { %v470_v32 = vpack.c.bf16 %v459_v28, %v458_v26 }
 0x160   :  { %v974_v34 = vpop.eup %973  ;;  %821 = vmatprep.mubr.bf16.mxu1 %v470_v32 }
 0x161   :  { %v976_v36 = vpop.eup %975  ;;  %822 = vmatmul.mubr.bf16.gmra.mrb[8].mxu1 %v471_v30  ;;  %v464_v39 = vmul.f32 %v974_v34, %v1248_v0 }
 0x162   :  { %v978_v37 = vpop.eup %977  ;;  %v462_v44 = vmul.f32 %v976_v36, %v1251_v3 }
 0x163   :  { %v980_v38 = vpop.eup %979  ;;  %v465_v40 = vmul.f32 %v978_v37, %v1254_v11 }
 0x164   :  { %v463_v49 = vmul.f32 %v980_v38, %v1257_v22 }
 0x165   :  { %v473_v41 = vpack.c.bf16 %v465_v40, %v464_v39 }
 0x166   :  { %v472_v47 = vpack.c.bf16 %v463_v49, %v462_v44 }
 0x168   :  { %825 = vmatprep.mubr.bf16.mxu1 %v472_v47 }
 0x169   :  { %826 = vmatmul.mubr.bf16.gmra.mrb[12].mxu1 %v473_v41 }
 0x223   :  { %v815_v52 = vpop.f32.mrb[0].mxu1 }
 0x224   :  { %v637_v42 = vadd.f32 %v815_v52, %v1152_v6  ;;  %v572_v43 = vpop.f32.mrb[1].mxu1 }
 0x225   :  { %v635_v45 = vadd.f32 %v572_v43, %v1148_v4  ;;  %v816_v15 = vpop.f32.mrb[2].mxu1 }
 0x226   :  { %653 = vst [vmem:[#allocation8 + $0x10] sm:$0xff] %v637_v42  ;;  %v638_v0 = vadd.f32 %v816_v15, %v1156_v9  ;;  %v575_v25 = vpop.f32.mrb[3].mxu1 }
 0x227   :  { %651 = vst [vmem:[#allocation8] sm:$0xff] %v635_v45  ;;  %v636_v3 = vadd.f32 %v575_v25, %v1150_v5 }
 0x228   :  { %654 = vst [vmem:[#allocation8 + $0x18] sm:$0xff] %v638_v0 }
 0x229   :  { %652 = vst [vmem:[#allocation8 + $0x8] sm:$0xff] %v636_v3 }
 0x22b   :  { %v819_v11 = vpop.f32.mrb[4].mxu1 }
 0x22c   :  { %v641_v22 = vadd.f32 %v819_v11, %v1164_v14  ;;  %v588_v46 = vpop.f32.mrb[5].mxu1 }
 0x22d   :  { %v639_v48 = vadd.f32 %v588_v46, %v1158_v10  ;;  %v820_v6 = vpop.f32.mrb[6].mxu1 }
 0x22e   :  { %657 = vst [vmem:[#allocation8 + $0x30] sm:$0xff] %v641_v22  ;;  %v642_v4 = vadd.f32 %v820_v6, %v1167_v17  ;;  %v591_v18 = vpop.f32.mrb[7].mxu1 }
 0x22f   :  { %655 = vst [vmem:[#allocation8 + $0x20] sm:$0xff] %v639_v48  ;;  %v640_v9 = vadd.f32 %v591_v18, %v1162_v13 }
 0x230   :  { %658 = vst [vmem:[#allocation8 + $0x38] sm:$0xff] %v642_v4 }
 0x231   :  { %656 = vst [vmem:[#allocation8 + $0x28] sm:$0xff] %v640_v9 }
 0x234   :  { %v823_v27 = vpop.f32.mrb[8].mxu1 }
 0x235   :  { %v645_v5 = vadd.f32 %v823_v27, %v1174_v21  ;;  %v604_v50 = vpop.f32.mrb[9].mxu1 }
 0x236   :  { %v643_v53 = vadd.f32 %v604_v50, %v1170_v19  ;;  %v824_v14 = vpop.f32.mrb[10].mxu1 }
 0x237   :  { %661 = vst [vmem:[#allocation8 + $0x50] sm:$0xff] %v645_v5  ;;  %v646_v10 = vadd.f32 %v824_v14, %v1177_v23  ;;  %v607_v54 = vpop.f32.mrb[11].mxu1 }
 0x238   :  { %659 = vst [vmem:[#allocation8 + $0x40] sm:$0xff] %v643_v53  ;;  %v644_v17 = vadd.f32 %v607_v54, %v1172_v20 }
 0x239   :  { %662 = vst [vmem:[#allocation8 + $0x58] sm:$0xff] %v646_v10 }
 0x23a   :  { %660 = vst [vmem:[#allocation8 + $0x48] sm:$0xff] %v644_v17 }
 0x23c   :  { %v827_v55 = vpop.f32.mrb[12].mxu1 }
 0x23d   :  { %v649_v13 = vadd.f32 %v827_v55, %v1189_v56  ;;  %v620_v57 = vpop.f32.mrb[13].mxu1 }
 0x23e   :  { %v647_v21 = vadd.f32 %v620_v57, %v1179_v24  ;;  %v828_v58 = vpop.f32.mrb[14].mxu1 }
 0x23f   :  { %665 = vst [vmem:[#allocation8 + $0x70] sm:$0xff] %v649_v13  ;;  %v650_v19 = vadd.f32 %v828_v58, %v1192_v60  ;;  %v623_v59 = vpop.f32.mrb[15].mxu1 }
 0x240   :  { %663 = vst [vmem:[#allocation8 + $0x60] sm:$0xff] %v647_v21  ;;  %v648_v23 = vadd.f32 %v623_v59, %v1187_v51 }
 0x241   :  { %666 = vst [vmem:[#allocation8 + $0x78] sm:$0xff] %v650_v19 }
 0x242   :  { %664 = vst [vmem:[#allocation8 + $0x68] sm:$0xff] %v648_v23 }
 0x243   :  { %1058 = shalt.err (!%p1055_p0)
}
 0x244   :  { %s1059_s27 = scalar_lea.hbm %s1310_s3, 2048 }
 0x245   :  { %p1060_p1 = scmp.ne.s32.totalorder %s1310_s3, %s1059_s27  ;;  %p1063_p2 = scmp.lt.u32.totalorder %s1059_s27, %s1310_s3 }
 0x247   :  { %p1065_p3 = pnand %p1063_p2, %p1060_p1 }
 0x249   :  { %1068 = shalt.err (!%p1065_p3)
}
 0x24a   :  { %678 = dma.vmem_to_hbm [thread:$0]  %s673_s22, 2048, %s1310_s3, [#allocation4], %s1079_s1, %s1079_s1, %s1080_s9  }
 0x24b   :  { %1073 = dma.done.wait [#allocation4], 2048  }
 0x24c   :  { %1074 = vsyncadd [#allocation4], 4294965248 }
 0x24d   :  { %682 = vsyncpa [#allocation3], 1 }
 0x24e   :  { %683 = vsyncpa [#allocation6], 1 }
 0x24f   :  { %684 = vsyncpa [#allocation4], 1 }

</bundles_post_ra>
